<compile_context>
chip_gen: v6e
topology: v6e:2x2x1
jax: 0.10.0
libtpu: 0.0.40
codegen_flags: <defaults>
</compile_context>

<pallas_src>
import jax
import jax.numpy as jnp
from jax import lax
from jax.experimental import pallas as pl
from jax.experimental.pallas import tpu as pltpu


# --------------------------------------------------------------------------
# Kernel: one batch tile.  Input arrives in natural [batch, feature] layout;
# all compute/output is in lane-dense [feature, batch] layout.
# --------------------------------------------------------------------------
def _domain_recognizer_kernel(x_ref, w1_ref, b1_ref, w2_ref, b2_ref,
                              w3_ref, b3_ref, out_ref):
    """
    x_ref  : [TB, F]  (caller dtype)  input tile, BN0 already folded into W1/b1
    w1_ref : [128, F] bf16            b1_ref: [128, 1] f32
    w2_ref : [32, 128] bf16           b2_ref: [32,  1] f32
    w3_ref : [D,   32] bf16           b3_ref: [D,   1] f32
    out_ref: [D,  TB] f32             softmax probs (each column sums to 1)
    """
    def leaky_relu(h):
        return jnp.where(h > 0, h, 0.2 * h)

    # In-kernel bf16 cast: the wrapper never materializes a casted/transposed
    # copy of x in HBM (that was a full extra HBM pass before).
    xb = x_ref[...].astype(jnp.bfloat16)                          # [TB, F]

    # Linear(F,128) (+ folded BN0) + LeakyReLU(0.2).
    # Contract the F axis of both operands (same "NT" dimension numbers as
    # q @ k^T in flash attention) -> lane-dense [128, TB]; the operand
    # transpose is handled by Mosaic on the XLU slot.
    h1 = lax.dot_general(w1_ref[...], xb, (((1,), (1,)), ((), ())),
                         preferred_element_type=jnp.float32)
    h1 = leaky_relu(h1 + b1_ref[...])                             # f32 [128,TB]
    h1b = h1.astype(jnp.bfloat16)     # halve the stored intermediate (v5e vst)

    # Linear(128,32) (+ folded BN1, Dropout=id) + LeakyReLU(0.2)
    h2 = jnp.dot(w2_ref[...], h1b, preferred_element_type=jnp.float32)
    h2 = leaky_relu(h2 + b2_ref[...])                             # f32 [32,TB]

    # Linear(32,D) (+ folded BN2, Dropout=id)
    logits = jnp.dot(w3_ref[...], h2.astype(jnp.bfloat16),
                     preferred_element_type=jnp.float32) + b3_ref[...]

    # Numerically-stable softmax over the class axis (sublane axis; each
    # column of the [D, TB] tile is one batch row).
    m = jnp.max(logits, axis=0, keepdims=True)
    e = jnp.exp(logits - m)
    denom = jnp.sum(e, axis=0, keepdims=True)
    out_ref[...] = e * pl.reciprocal(denom, approx=False)


# --------------------------------------------------------------------------
# Host-side helpers
# --------------------------------------------------------------------------
def _fold_bn_into_linear(w, b, gamma, beta, mean, var, eps=1e-5):
    """Exact eval-mode fusion of Linear(BatchNorm1d(x)).

    BN(x) = x*s + t with s = gamma/sqrt(var+eps), t = beta - mean*s, so
    Linear(BN(x)) = x @ (W*s).T + (b + W@t)  (W is PyTorch [out, in] layout).
    """
    s = gamma * jax.lax.rsqrt(var + eps)
    t = beta - mean * s
    return w * s[None, :], b + w @ t


def _round_up(n, m):
    return (n + m - 1) // m * m


def _choose_tile(batch, tile_b):
    """Batch tile: big (amortize per-step overhead), multiple of 128
    (lane-dense stores), but small enough that the grid has >= 2 steps when
    the batch allows it (so both v7x TensorCores get work)."""
    if batch <= 128:
        return batch                     # single full-extent block
    half = _round_up(pl.cdiv(batch, 2), 128)
    return max(128, min(tile_b, half))


def domain_recognizer_forward(x, params, *, eps=1e-5, tile_b=8192,
                              transposed_output=False):
    """Eval-mode DomainRecognizer forward.

    x: [B, F] (f32 or bf16).  Returns [B, D] probabilities, or the lane-dense
    [D, B] slab directly (no extra XLA transpose pass) if transposed_output.

    params: dict with
      "bn0" : (gamma, beta, running_mean, running_var)  each [F]
      "lin1": (W [128, F],  b [128])
      "bn1" : (gamma, beta, running_mean, running_var)  each [128]
      "lin2": (W [32, 128], b [32])
      "bn2" : (gamma, beta, running_mean, running_var)  each [32]
      "lin3": (W [D, 32],   b [D])
    """
    B, F = x.shape

    # --- exact eval-mode parameter folding (BN -> following Linear) -------
    w1, b1 = _fold_bn_into_linear(*params["lin1"], *params["bn0"], eps=eps)
    w2, b2 = _fold_bn_into_linear(*params["lin2"], *params["bn1"], eps=eps)
    w3, b3 = _fold_bn_into_linear(*params["lin3"], *params["bn2"], eps=eps)
    H1, H2, D = w1.shape[0], w2.shape[0], w3.shape[0]

    # Weights as bf16 (tiny, resident in VMEM); biases stay f32.
    w1b = w1.astype(jnp.bfloat16)
    w2b = w2.astype(jnp.bfloat16)
    w3b = w3.astype(jnp.bfloat16)
    b1c = b1.astype(jnp.float32).reshape(H1, 1)
    b2c = b2.astype(jnp.float32).reshape(H2, 1)
    b3c = b3.astype(jnp.float32).reshape(D, 1)

    tb = _choose_tile(B, tile_b)
    grid = pl.cdiv(B, tb)     # ragged tail handled by Pallas partial blocks

    x_bytes = x.dtype.itemsize
    cost = pl.CostEstimate(
        flops=2 * B * (F * H1 + H1 * H2 + H2 * D),
        transcendentals=B * D,
        bytes_accessed=B * F * x_bytes + B * D * 4
        + 2 * (w1b.size + w2b.size + w3b.size) + 4 * (H1 + H2 + D),
    )

    # VMEM @ tb=8192, F=64: x tile 2 MiB x2 bufs + f32 h1 4 MiB + misc, well
    # under the 32 MiB scoped default on every generation (incl. v7x).  For
    # F >~ 512 or tb >~ 16K, lower tile_b or set vmem_limit_bytes explicitly.
    out_t = pl.pallas_call(
        _domain_recognizer_kernel,
        out_shape=jax.ShapeDtypeStruct((D, B), jnp.float32),
        grid_spec=pl.GridSpec(
            grid=(grid,),
            in_specs=[
                pl.BlockSpec((tb, F), lambda i: (i, 0)),    # x tile (streamed)
                pl.BlockSpec((H1, F), lambda i: (0, 0)),    # weights: resident
                pl.BlockSpec((H1, 1), lambda i: (0, 0)),
                pl.BlockSpec((H2, H1), lambda i: (0, 0)),
                pl.BlockSpec((H2, 1), lambda i: (0, 0)),
                pl.BlockSpec((D, H2), lambda i: (0, 0)),
                pl.BlockSpec((D, 1), lambda i: (0, 0)),
            ],
            out_specs=pl.BlockSpec((D, tb), lambda i: (0, i)),  # lane-dense
        ),
        compiler_params=pltpu.CompilerParams(
            dimension_semantics=("parallel",),              # megacore on v7x
        ),
        cost_estimate=cost,
    )(x, w1b, b1c, w2b, b2c, w3b, b3c)

    if transposed_output:
        return out_t                 # [D, B] lane-dense, no extra XLA pass
    return out_t.T                   # [B, D] module contract (tiny at D=4)


# --------------------------------------------------------------------------
# Pure-JAX references for validation
# --------------------------------------------------------------------------
def _reference_eval_f32(x, params, eps=1e-5):
    """Literal eval-mode module in f32 (BN with running stats, Dropout = id)."""
    def bn(h, g, b, m, v):
        return (h - m) * (g * jax.lax.rsqrt(v + eps)) + b

    def leaky(h):
        return jnp.where(h > 0, h, 0.2 * h)

    h = bn(x, *params["bn0"])
    h = leaky(h @ params["lin1"][0].T + params["lin1"][1])
    h = bn(h, *params["bn1"])                 # Dropout(0.2): identity in eval
    h = leaky(h @ params["lin2"][0].T + params["lin2"][1])
    h = bn(h, *params["bn2"])                 # Dropout(0.2): identity in eval
    logits = h @ params["lin3"][0].T + params["lin3"][1]
    return jax.nn.softmax(logits, axis=-1)


def _reference_kernel_numerics(x, params, eps=1e-5):
    """Plain-JAX model of the kernel's exact numerics (folded params, bf16)."""
    w1, b1 = _fold_bn_into_linear(*params["lin1"], *params["bn0"], eps=eps)
    w2, b2 = _fold_bn_into_linear(*params["lin2"], *params["bn1"], eps=eps)
    w3, b3 = _fold_bn_into_linear(*params["lin3"], *params["bn2"], eps=eps)
    bf, f32 = jnp.bfloat16, jnp.float32

    def mm(a, w):
        return jnp.dot(a.astype(bf), w.astype(bf).T, preferred_element_type=f32)

    def leaky(h):
        return jnp.where(h > 0, h, 0.2 * h)

    h1 = leaky(mm(x, w1) + b1)
    h2 = leaky(mm(h1, w2) + b2)
    logits = mm(h2, w3) + b3
    return jax.nn.softmax(logits, axis=-1)


# --------------------------------------------------------------------------
# Demo / correctness check
# --------------------------------------------------------------------------
if __name__ == "__main__":
    input_dim = 64          # constructor arg of DomainRecognizer
    output_dim = 4          # number of source domains
    hidden1, hidden2 = 128, 32   # fixed by the module
    batch = 300             # NOT a multiple of 128 -> exercises the ragged
                            # last block and the >=2-step grid (tb becomes 256)

    key = jax.random.PRNGKey(0)
    keys = jax.random.split(key, 19)

    def linear_init(kw, kb, fan_out, fan_in):
        bound = 1.0 / jnp.sqrt(fan_in)
        w = jax.random.uniform(kw, (fan_out, fan_in), minval=-bound,
                               maxval=bound, dtype=jnp.float32)
        b = jax.random.uniform(kb, (fan_out,), minval=-bound, maxval=bound,
                               dtype=jnp.float32)
        return w, b

    def bn_init(kg, kb, km, kv, n):
        gamma = 1.0 + 0.1 * jax.random.normal(kg, (n,), dtype=jnp.float32)
        beta = 0.1 * jax.random.normal(kb, (n,), dtype=jnp.float32)
        mean = 0.1 * jax.random.normal(km, (n,), dtype=jnp.float32)
        var = jax.random.uniform(kv, (n,), minval=0.5, maxval=1.5,
                                 dtype=jnp.float32)
        return gamma, beta, mean, var

    params = {
        "bn0": bn_init(keys[0], keys[1], keys[2], keys[3], input_dim),
        "lin1": linear_init(keys[4], keys[5], hidden1, input_dim),
        "bn1": bn_init(keys[6], keys[7], keys[8], keys[9], hidden1),
        "lin2": linear_init(keys[10], keys[11], hidden2, hidden1),
        "bn2": bn_init(keys[12], keys[13], keys[14], keys[15], hidden2),
        "lin3": linear_init(keys[16], keys[17], output_dim, hidden2),
    }
    x = jax.random.normal(keys[18], (batch, input_dim), dtype=jnp.float32)

    out = domain_recognizer_forward(x, params)
    out = jax.block_until_ready(out)

    assert out.shape == (batch, output_dim)

    # Tight check vs. a plain-JAX model of the kernel's exact numerics.
    ref_tight = _reference_kernel_numerics(x, params)
    assert jnp.allclose(out, ref_tight, atol=1e-4, rtol=1e-4), (
        "max|diff| vs mirrored ref = "
        f"{float(jnp.max(jnp.abs(out - ref_tight)))}")

    # Looser check vs. the literal f32 eval-mode module (bf16-induced error).
    ref_module = _reference_eval_f32(x, params)
    assert jnp.allclose(out, ref_module, atol=2e-2), (
        "max|diff| vs f32 module ref = "
        f"{float(jnp.max(jnp.abs(out - ref_module)))}")

    # Softmax rows sum to 1.
    assert jnp.allclose(jnp.sum(out, axis=-1), 1.0, atol=1e-5)

    # Lane-dense [D, B] path (no wrapper transpose) agrees as well.
    out_t = jax.block_until_ready(
        domain_recognizer_forward(x, params, transposed_output=True))
    assert out_t.shape == (output_dim, batch)
    assert jnp.allclose(out_t.T, out, atol=1e-6)

    print("KERNEL_OK")
</pallas_src>

<mosaic_0001>
module attributes {stable_mosaic.version = 11 : i64} {
  func.func @_domain_recognizer_kernel(%arg0: i32, %arg1: memref<256x64xf32, #tpu.memory_space<vmem>>, %arg2: memref<128x64xbf16, #tpu.memory_space<vmem>>, %arg3: memref<128x1xf32, #tpu.memory_space<vmem>>, %arg4: memref<32x128xbf16, #tpu.memory_space<vmem>>, %arg5: memref<32x1xf32, #tpu.memory_space<vmem>>, %arg6: memref<4x32xbf16, #tpu.memory_space<vmem>>, %arg7: memref<4x1xf32, #tpu.memory_space<vmem>>, %arg8: memref<4x256xf32, #tpu.memory_space<vmem>>) attributes {dimension_semantics = [#tpu.dimension_semantics<parallel>], iteration_bounds = array<i64: 2>, scalar_prefetch = 0 : i64, scratch_operands = 0 : i64, tpu.core_type = #tpu.core_type<tc>, window_params = [{transform_indices = @transform_0, window_bounds = array<i64: 256, 64>}, {pipeline_mode = #tpu.pipeline_mode<synchronous>, transform_indices = @transform_1, window_bounds = array<i64: 128, 64>}, {pipeline_mode = #tpu.pipeline_mode<synchronous>, transform_indices = @transform_2, window_bounds = array<i64: 128, 1>}, {pipeline_mode = #tpu.pipeline_mode<synchronous>, transform_indices = @transform_3, window_bounds = array<i64: 32, 128>}, {pipeline_mode = #tpu.pipeline_mode<synchronous>, transform_indices = @transform_4, window_bounds = array<i64: 32, 1>}, {pipeline_mode = #tpu.pipeline_mode<synchronous>, transform_indices = @transform_5, window_bounds = array<i64: 4, 32>}, {pipeline_mode = #tpu.pipeline_mode<synchronous>, transform_indices = @transform_6, window_bounds = array<i64: 4, 1>}, {transform_indices = @transform_7, window_bounds = array<i64: 4, 256>}]} {
    %c0 = arith.constant 0 : index
    %c0_0 = arith.constant 0 : index
    %0 = vector.load %arg1[%c0, %c0_0] : memref<256x64xf32, #tpu.memory_space<vmem>>, vector<256x64xf32>
    %1 = arith.truncf %0 : vector<256x64xf32> to vector<256x64xbf16>
    %c0_1 = arith.constant 0 : index
    %c0_2 = arith.constant 0 : index
    %2 = vector.load %arg2[%c0_1, %c0_2] : memref<128x64xbf16, #tpu.memory_space<vmem>>, vector<128x64xbf16>
    %cst = arith.constant dense<0.000000e+00> : vector<128x256xf32>
    %3 = tpu.matmul %2, %1, %cst {dimension_numbers = #tpu.dot_dimension_numbers<[1], [1], [0], [0], [0, 0, 1, 0], [], []>} : vector<128x64xbf16>, vector<256x64xbf16>, vector<128x256xf32> -> vector<128x256xf32>
    %c0_3 = arith.constant 0 : index
    %c0_4 = arith.constant 0 : index
    %4 = vector.load %arg3[%c0_3, %c0_4] : memref<128x1xf32, #tpu.memory_space<vmem>>, vector<128x1xf32>
    %5 = vector.broadcast %4 : vector<128x1xf32> to vector<128x256xf32>
    %6 = arith.addf %3, %5 : vector<128x256xf32>
    %cst_5 = arith.constant 0.000000e+00 : f32
    %7 = vector.broadcast %cst_5 : f32 to vector<128x256xf32>
    %8 = arith.cmpf ogt, %6, %7 : vector<128x256xf32>
    %cst_6 = arith.constant 2.000000e-01 : f32
    %9 = vector.broadcast %cst_6 : f32 to vector<128x256xf32>
    %10 = arith.mulf %9, %6 : vector<128x256xf32>
    %11 = arith.select %8, %6, %10 : vector<128x256xi1>, vector<128x256xf32>
    %12 = arith.truncf %11 : vector<128x256xf32> to vector<128x256xbf16>
    %c0_7 = arith.constant 0 : index
    %c0_8 = arith.constant 0 : index
    %13 = vector.load %arg4[%c0_7, %c0_8] : memref<32x128xbf16, #tpu.memory_space<vmem>>, vector<32x128xbf16>
    %cst_9 = arith.constant dense<0.000000e+00> : vector<32x256xf32>
    %14 = tpu.matmul %13, %12, %cst_9 {dimension_numbers = #tpu.dot_dimension_numbers<[1], [0], [0], [1], [0, 0, 1, 1], [], []>} : vector<32x128xbf16>, vector<128x256xbf16>, vector<32x256xf32> -> vector<32x256xf32>
    %c0_10 = arith.constant 0 : index
    %c0_11 = arith.constant 0 : index
    %15 = vector.load %arg5[%c0_10, %c0_11] : memref<32x1xf32, #tpu.memory_space<vmem>>, vector<32x1xf32>
    %16 = vector.broadcast %15 : vector<32x1xf32> to vector<32x256xf32>
    %17 = arith.addf %14, %16 : vector<32x256xf32>
    %cst_12 = arith.constant 0.000000e+00 : f32
    %18 = vector.broadcast %cst_12 : f32 to vector<32x256xf32>
    %19 = arith.cmpf ogt, %17, %18 : vector<32x256xf32>
    %cst_13 = arith.constant 2.000000e-01 : f32
    %20 = vector.broadcast %cst_13 : f32 to vector<32x256xf32>
    %21 = arith.mulf %20, %17 : vector<32x256xf32>
    %22 = arith.select %19, %17, %21 : vector<32x256xi1>, vector<32x256xf32>
    %c0_14 = arith.constant 0 : index
    %c0_15 = arith.constant 0 : index
    %23 = vector.load %arg6[%c0_14, %c0_15] : memref<4x32xbf16, #tpu.memory_space<vmem>>, vector<4x32xbf16>
    %24 = arith.truncf %22 : vector<32x256xf32> to vector<32x256xbf16>
    %cst_16 = arith.constant dense<0.000000e+00> : vector<4x256xf32>
    %25 = tpu.matmul %23, %24, %cst_16 {dimension_numbers = #tpu.dot_dimension_numbers<[1], [0], [0], [1], [0, 0, 1, 1], [], []>} : vector<4x32xbf16>, vector<32x256xbf16>, vector<4x256xf32> -> vector<4x256xf32>
    %c0_17 = arith.constant 0 : index
    %c0_18 = arith.constant 0 : index
    %26 = vector.load %arg7[%c0_17, %c0_18] : memref<4x1xf32, #tpu.memory_space<vmem>>, vector<4x1xf32>
    %27 = vector.broadcast %26 : vector<4x1xf32> to vector<4x256xf32>
    %28 = arith.addf %25, %27 : vector<4x256xf32>
    %cst_19 = arith.constant dense<0xFF800000> : vector<256xf32>
    %29 = vector.multi_reduction <maximumf>, %28, %cst_19 [0] : vector<4x256xf32> to vector<256xf32>
    %30 = vector.shape_cast %29 : vector<256xf32> to vector<1x256xf32>
    %31 = vector.broadcast %30 : vector<1x256xf32> to vector<4x256xf32>
    %32 = arith.subf %28, %31 : vector<4x256xf32>
    %33 = math.exp %32 : vector<4x256xf32>
    %cst_20 = arith.constant dense<0.000000e+00> : vector<256xf32>
    %34 = vector.multi_reduction <add>, %33, %cst_20 [0] : vector<4x256xf32> to vector<256xf32>
    %35 = vector.shape_cast %34 : vector<256xf32> to vector<1x256xf32>
    %36 = tpu.reciprocal %35 : vector<1x256xf32> -> vector<1x256xf32>
    %37 = vector.broadcast %36 : vector<1x256xf32> to vector<4x256xf32>
    %38 = arith.mulf %33, %37 : vector<4x256xf32>
    %c0_21 = arith.constant 0 : index
    %c0_22 = arith.constant 0 : index
    %39 = vector.load %arg8[%c0_21, %c0_22] : memref<4x256xf32, #tpu.memory_space<vmem>>, vector<4x256xf32>
    tpu.vector_store %arg8[%c0_21, %c0_22], %38 {strides = array<i32>} : memref<4x256xf32, #tpu.memory_space<vmem>>, vector<4x256xf32>,
    return
  }
  func.func @transform_0(%arg0: i32) -> (i32, i32) {
    %c0_i32 = arith.constant 0 : i32
    %c0_i32_0 = arith.constant 0 : i32
    return %arg0, %c0_i32 : i32, i32
  }
  func.func @transform_1(%arg0: i32) -> (i32, i32) {
    %c0_i32 = arith.constant 0 : i32
    %c0_i32_0 = arith.constant 0 : i32
    %c0_i32_1 = arith.constant 0 : i32
    return %c0_i32, %c0_i32_0 : i32, i32
  }
  func.func @transform_2(%arg0: i32) -> (i32, i32) {
    %c0_i32 = arith.constant 0 : i32
    %c0_i32_0 = arith.constant 0 : i32
    %c0_i32_1 = arith.constant 0 : i32
    return %c0_i32, %c0_i32_0 : i32, i32
  }
  func.func @transform_3(%arg0: i32) -> (i32, i32) {
    %c0_i32 = arith.constant 0 : i32
    %c0_i32_0 = arith.constant 0 : i32
    %c0_i32_1 = arith.constant 0 : i32
    return %c0_i32, %c0_i32_0 : i32, i32
  }
  func.func @transform_4(%arg0: i32) -> (i32, i32) {
    %c0_i32 = arith.constant 0 : i32
    %c0_i32_0 = arith.constant 0 : i32
    %c0_i32_1 = arith.constant 0 : i32
    return %c0_i32, %c0_i32_0 : i32, i32
  }
  func.func @transform_5(%arg0: i32) -> (i32, i32) {
    %c0_i32 = arith.constant 0 : i32
    %c0_i32_0 = arith.constant 0 : i32
    %c0_i32_1 = arith.constant 0 : i32
    return %c0_i32, %c0_i32_0 : i32, i32
  }
  func.func @transform_6(%arg0: i32) -> (i32, i32) {
    %c0_i32 = arith.constant 0 : i32
    %c0_i32_0 = arith.constant 0 : i32
    %c0_i32_1 = arith.constant 0 : i32
    return %c0_i32, %c0_i32_0 : i32, i32
  }
  func.func @transform_7(%arg0: i32) -> (i32, i32) {
    %c0_i32 = arith.constant 0 : i32
    %c0_i32_0 = arith.constant 0 : i32
    return %c0_i32, %arg0 : i32, i32
  }
}

</mosaic_0001>

<bundles_post_ra>
// kernel: tpu_custom_call.1
= control target key start
LH: loop header
LB: loop body
LE: loop exit
PB: predicated region body
PF: predicated region fallthrough
CT: control target
= control target key end

     0   :  { %12 = vsyncpa [#allocation3], 0  ;;  %s1769_s0 = inlined_call_operand.vmem [shape: f32[300,64], index: 0, kind: input, shape index: {}]   ;;  %s1770_s1 = inlined_call_operand.vmem [shape: bf16[128,64], index: 1, kind: input, shape index: {}]   ;;  %s1771_s2 = inlined_call_operand.vmem [shape: f32[128,1], index: 2, kind: input, shape index: {}]   ;;  %s1772_s3 = inlined_call_operand.vmem [shape: bf16[32,128], index: 3, kind: input, shape index: {}]   ;;  %s1773_s4 = inlined_call_operand.vmem [shape: f32[32,1], index: 4, kind: input, shape index: {}]   ;;  %s1774_s5 = inlined_call_operand.vmem [shape: bf16[4,32], index: 5, kind: input, shape index: {}]   ;;  %s1775_s6 = inlined_call_operand.vmem [shape: f32[4,1], index: 6, kind: input, shape index: {}]   ;;  %s1776_s7 = inlined_call_operand.hbm [shape: f32[4,300], index: 7, kind: output, shape index: {}]  }
   0x1   :  { %14 = vsyncpa [#allocation3 + $0x1], 0  ;;  %s1339_s24 = smov 0   ;;  %s1341_s25 = smov 0  }
   0x2   :  { %s1343_s26 = smov 0   ;;  %s1345_s27 = smov 0  }
   0x3 LB: > { %s1360_s28 = sadd.s32 4294967295, %s1295_s27   ;;  %s1100_s29 = sadd.s32 4294967294, %s1295_s27   ;;  %s1295_s27 = sphi %s1345_s27, %s1782_s27   ;;  %s1291_s26 = sphi %s1343_s26, %s1781_s26   ;;  %s1287_s25 = sphi %s1341_s25, %s1780_s25   ;;  %s1283_s24 = sphi %s1339_s24, %s1779_s24  }
   0x4   : > { %s1364_s30 = sadd.s32 1, %s1295_s27   ;;  %s179_s8 = sadd.s32 1, %s1291_s26 }
   0x5   : > { %s176_s9 = ssub.s32 %s1295_s27, %s1364_s30  ;;  %p189_p0 = scmp.ne.s32.totalorder %s1291_s26, %s1287_s25 }
   0x6   : > { %p177_p1 = scmp.eq.s32.totalorder %s176_s9, 0  ;;  %p190_p2 = scmp.eq.s32.totalorder %s1360_s28, 1 }
   0x7   : > { %p195_p3 = scmp.ne.s32.totalorder %s1287_s25, %s1283_s24  ;;  %p196_p4 = scmp.eq.s32.totalorder %s1100_s29, 1 }
   0x8   : > { %s1375_s10 = scalar_select %p177_p1, %s1291_s26, %s179_s8  }
   0x9   : > { %p1377_p5 = por %p190_p2, %p189_p0  ;;  %p1381_p6 = por %p196_p4, %p195_p3 }
   0xa   : > { %p1103_p7 = scmp.ge.s32.totalorder %s1295_s27, 1  ;;  %p249_p8 = scmp.lt.s32.totalorder %s1295_s27, 3 }
   0xc   : > { %p250_p9 = pnand %p1103_p7, %p249_p8 }
   0xd   : > { %s1105_s13 = sshll.u32 (!%p250_p9), %s1360_s28, 5  ;;  %s282_s14 = sand.u32 (!%p250_p9), 1, %s1287_s25  }
   0xe   : > { %253 = sbr.rel (%p250_p9) target bundleno = 892 (0x37c), region = 48  ;;  %p290_p10 = scmp.lt.s32.totalorder (!%p250_p9), %s1105_s13, 37 }
   0xf   : > { %s1104_s15 = sshll.u32 (!%p250_p9), %s282_s14, 3  ;;  %s1722_s17 = scalar_lea.sflag (!%p250_p9), [#allocation3], %s282_s14 }
  0x13   : > { %v1391_v0 = vld [vmem:[%s1770_s1] sm:$0xff]   ;;  %vm505_vm0 = vcmask 523264   ;;  %s1784_s13 = smov (!%p290_p10, %s1105_s13), 37  ;;  %v1297_v1 = vmov 0   ;;  %v383_v2 = vld [vmem:[%s1771_s2 + $0x70] sm:$0xff]  ;;  %v384_v3 = vld [vmem:[%s1771_s2 + $0x78] sm:$0xff] }
  0x14   : > { %1152 = vmatprep.mubr.msk.bf16.mxu0 %vm505_vm0, %v1391_v0  ;;  %1215 = vset.pattern.permute.xlu0 %v1297_v1  ;;  %s1106_s16 = sshll.u32 %s1784_s13, 3  ;;  %v381_v22 = vld [vmem:[%s1771_s2 + $0x60] sm:$0xff]  ;;  %v382_v24 = vld [vmem:[%s1771_s2 + $0x68] sm:$0xff]  ;;  %v379_v25 = vld [vmem:[%s1771_s2 + $0x50] sm:$0xff]  ;;  %s1127_s18 = sshll.u32 (%p1377_p5), %s1360_s28, 1 }
  0x15   : > { %1216 = vset.pattern.permute.xlu1 %v1297_v1  ;;  %875 = vmatprep.mubr.bf16.mxu1 %v1297_v1  ;;  %s1401_s19 = scalar_lea.vmem %s1769_s0, %s1106_s16  ;;  %v377_v27 = vld [vmem:[%s1771_s2 + $0x40] sm:$0xff]  ;;  %v380_v30 = vld [vmem:[%s1771_s2 + $0x58] sm:$0xff]  ;;  %v375_v35 = vld [vmem:[%s1771_s2 + $0x30] sm:$0xff]  ;;  %s284_s16 = scalar_lea.vmem [#allocation2], %s1104_s15 }
  0x16   : > { %v335_v4 = vld [vmem:[%s1401_s19 + $0xf0] sm:$0xff]  ;;  %v336_v5 = vld [vmem:[%s1401_s19 + $0xf8] sm:$0xff]  ;;  %457 = vperm.xlu0 %1215, %v383_v2   ;;  %v333_v9 = vld [vmem:[%s1401_s19 + $0xe0] sm:$0xff]  ;;  %447 = vperm.xlu1 %1216, %v381_v22   ;;  %s1029_s20 = ssub.s32 (%p1377_p5), 3, %s1127_s18 }
  0x17   : > { %v319_v6 = vld [vmem:[%s1401_s19 + $0x70] sm:$0xff]  ;;  %v352_v7 = vpack.c.bf16 %v336_v5, %v335_v4  ;;  %v320_v8 = vld [vmem:[%s1401_s19 + $0x78] sm:$0xff]  ;;  %v334_v10 = vld [vmem:[%s1401_s19 + $0xe8] sm:$0xff]  ;;  %p1030_p11 = scmp.lt.s32.totalorder (%p1377_p5), %s1029_s20, 2 }
  0x18   : > { %v344_v11 = vpack.c.bf16 %v320_v8, %v319_v6  ;;  %v351_v12 = vpack.c.bf16 %v334_v10, %v333_v9  ;;  %v317_v13 = vld [vmem:[%s1401_s19 + $0x60] sm:$0xff]  ;;  %v318_v14 = vld [vmem:[%s1401_s19 + $0x68] sm:$0xff]  ;;  %v331_v17 = vld [vmem:[%s1401_s19 + $0xd0] sm:$0xff] }
  0x19   : > { %1168 = vmatprep.subr.msk.bf16.mxu0 %vm505_vm0, %v352_v7  ;;  %v343_v16 = vpack.c.bf16 %v318_v14, %v317_v13  ;;  %v332_v18 = vld [vmem:[%s1401_s19 + $0xd8] sm:$0xff]  ;;  %v315_v21 = vld [vmem:[%s1401_s19 + $0x50] sm:$0xff]  ;;  %v329_v28 = vld [vmem:[%s1401_s19 + $0xc0] sm:$0xff] }
  0x1a   : > { %v552_v15 = vsel %vm505_vm0, %v344_v11, 0  ;;  %462 = vperm.xlu0 %1215, %v384_v3   ;;  %v350_v20 = vpack.c.bf16 %v332_v18, %v331_v17  ;;  %v316_v23 = vld [vmem:[%s1401_s19 + $0x58] sm:$0xff]  ;;  %v330_v29 = vld [vmem:[%s1401_s19 + $0xc8] sm:$0xff]  ;;  %452 = vperm.xlu1 %1216, %v382_v24   ;;  %v313_v33 = vld [vmem:[%s1401_s19 + $0x40] sm:$0xff] }
  0x1b   : > { %1137 = vmatpush3.bf16.xpose.msra.mxu0 %v552_v15  ;;  %v549_v19 = vsel %vm505_vm0, %v343_v16, 0  ;;  %v342_v26 = vpack.c.bf16 %v316_v23, %v315_v21  ;;  %v349_v32 = vpack.c.bf16 %v330_v29, %v329_v28  ;;  %v314_v34 = vld [vmem:[%s1401_s19 + $0x48] sm:$0xff]  ;;  %v373_v38 = vld [vmem:[%s1771_s2 + $0x20] sm:$0xff]  ;;  %v327_v39 = vld [vmem:[%s1401_s19 + $0xb0] sm:$0xff] }
  0x1c   : > { %1169 = vmatprep.subr.msk.bf16.mxu0 %vm505_vm0, %v351_v12  ;;  %v378_v36 = vld [vmem:[%s1771_s2 + $0x48] sm:$0xff]  ;;  %v341_v37 = vpack.c.bf16 %v314_v34, %v313_v33  ;;  %v328_v40 = vld [vmem:[%s1401_s19 + $0xb8] sm:$0xff]  ;;  %v371_v44 = vld [vmem:[%s1771_s2 + $0x10] sm:$0xff] }
  0x1d   : > { %v546_v31 = vsel %vm505_vm0, %v342_v26, 0  ;;  %v376_v41 = vld [vmem:[%s1771_s2 + $0x38] sm:$0xff]  ;;  %v348_v43 = vpack.c.bf16 %v328_v40, %v327_v39  ;;  %v311_v45 = vld [vmem:[%s1401_s19 + $0x30] sm:$0xff]  ;;  %v374_v47 = vld [vmem:[%s1771_s2 + $0x28] sm:$0xff] }
  0x1e   : > { %437 = vperm.xlu0 %1215, %v379_v25   ;;  %442 = vperm.xlu1 %1216, %v380_v30   ;;  %v543_v42 = vsel %vm505_vm0, %v341_v37, 0  ;;  %v312_v46 = vld [vmem:[%s1401_s19 + $0x38] sm:$0xff]  ;;  %v369_v49 = vld [vmem:[%s1771_s2] sm:$0xff]  ;;  %v326_v51 = vld [vmem:[%s1401_s19 + $0xa8] sm:$0xff] }
  0x1f   : > { %v340_v48 = vpack.c.bf16 %v312_v46, %v311_v45  ;;  %v325_v50 = vld [vmem:[%s1401_s19 + $0xa0] sm:$0xff]  ;;  %v372_v52 = vld [vmem:[%s1771_s2 + $0x18] sm:$0xff]  ;;  %v809_v55 = vld [vmem:[%s1773_s4 + $0x10] sm:$0xff] }
  0x20   : > { %v347_v54 = vpack.c.bf16 %v326_v51, %v325_v50  ;;  %v309_v56 = vld [vmem:[%s1401_s19 + $0x20] sm:$0xff]  ;;  %v310_v57 = vld [vmem:[%s1401_s19 + $0x28] sm:$0xff]  ;;  %v323_v61 = vld [vmem:[%s1401_s19 + $0x90] sm:$0xff] }
  0x21   : > { %v540_v53 = vsel %vm505_vm0, %v340_v48, 0  ;;  %v370_v58 = vld [vmem:[%s1771_s2 + $0x8] sm:$0xff]  ;;  %v339_v59 = vpack.c.bf16 %v310_v57, %v309_v56  ;;  %v807_v60 = vld [vmem:[%s1773_s4] sm:$0xff]  ;;  %v324_v62 = vld [vmem:[%s1401_s19 + $0x98] sm:$0xff] }
  0x22   : > { %427 = vperm.xlu0 %1215, %v377_v27   ;;  %432 = vperm.xlu1 %1216, %v378_v36   ;;  %v810_v63 = vld [vmem:[%s1773_s4 + $0x18] sm:$0xff]  ;;  %v346_v3 = vpack.c.bf16 %v324_v62, %v323_v61  ;;  %v925_v4 = vld [vmem:[%s1775_s6] sm:$0xf]  ;;  %v307_v5 = vld [vmem:[%s1401_s19 + $0x10] sm:$0xff] }
  0x23   : > { %1139 = vmatpush3.bf16.xpose.msra.mxu0 %v549_v19  ;;  %v537_v2 = vsel %vm505_vm0, %v339_v59, 0  ;;  %v308_v6 = vld [vmem:[%s1401_s19 + $0x18] sm:$0xff]  ;;  %v808_v7 = vld [vmem:[%s1773_s4 + $0x8] sm:$0xff]  ;;  %v321_v9 = vld [vmem:[%s1401_s19 + $0x80] sm:$0xff] }
  0x24   : > { %1170 = vmatprep.subr.msk.bf16.mxu0 %vm505_vm0, %v350_v20  ;;  %v338_v8 = vpack.c.bf16 %v308_v6, %v307_v5  ;;  %v322_v10 = vld [vmem:[%s1401_s19 + $0x88] sm:$0xff]  ;;  %v305_v13 = vld [vmem:[%s1401_s19] sm:$0xff]  ;;  %v1219_v18 = vld [vmem:[%s1770_s1 + $0x10] sm:$0xff]  }
  0x25   : > { %v345_v12 = vpack.c.bf16 %v322_v10, %v321_v9  ;;  %v306_v14 = vld [vmem:[%s1401_s19 + $0x8] sm:$0xff]  ;;  %v1220_v19 = vld [vmem:[%s1770_s1 + $0x18] sm:$0xff]   ;;  %v1223_v21 = vld [vmem:[%s1770_s1 + $0x30] sm:$0xff]  }
  0x26   : > { %417 = vperm.xlu0 %1215, %v375_v35   ;;  %422 = vperm.xlu1 %1216, %v376_v41   ;;  %v534_v11 = vsel %vm505_vm0, %v338_v8, 0  ;;  %v337_v15 = vpack.c.bf16 %v306_v14, %v305_v13  ;;  %v1218_v17 = vld [vmem:[%s1770_s1 + $0x8] sm:$0xff]   ;;  %v1224_v22 = vld [vmem:[%s1770_s1 + $0x38] sm:$0xff]  }
  0x27   : > { %v1222_v20 = vld [vmem:[%s1770_s1 + $0x28] sm:$0xff]  }
  0x28   : > { %v531_v16 = vsel %vm505_vm0, %v337_v15, 0 }
  0x2a   : > { %407 = vperm.xlu0 %1215, %v373_v38   ;;  %412 = vperm.xlu1 %1216, %v374_v47  }
  0x2b   : > { %1141 = vmatpush3.bf16.xpose.msra.mxu0 %v546_v31 }
  0x2c   : > { %1171 = vmatprep.subr.msk.bf16.mxu0 %vm505_vm0, %v349_v32 }
  0x2e   : > { %397 = vperm.xlu0 %1215, %v371_v44   ;;  %402 = vperm.xlu1 %1216, %v372_v52  }
  0x32   : > { %387 = vperm.xlu0 %1215, %v369_v49   ;;  %392 = vperm.xlu1 %1216, %v370_v58  }
  0x33   : > { %1143 = vmatpush3.bf16.xpose.msra.mxu0 %v543_v42 }
  0x34   : > { %1172 = vmatprep.subr.msk.bf16.mxu0 %vm505_vm0, %v348_v43 }
  0x36   : > { %823 = vperm.xlu0 %1215, %v809_v55   ;;  %828 = vperm.xlu1 %1216, %v810_v63  }
  0x3a   : > { %813 = vperm.xlu0 %1215, %v807_v60   ;;  %818 = vperm.xlu1 %1216, %v808_v7  }
  0x3b   : > { %1145 = vmatpush3.bf16.xpose.msra.mxu0 %v540_v53 }
  0x3c   : > { %1173 = vmatprep.subr.msk.bf16.mxu0 %vm505_vm0, %v347_v54 }
  0x3e   : > { %928 = vperm.xlu0 %1215, %v925_v4  }
  0x43   : > { %1147 = vmatpush3.bf16.xpose.msra.mxu0 %v537_v2 }
  0x44   : > { %1174 = vmatprep.subr.msk.bf16.mxu0 %vm505_vm0, %v346_v3 }
  0x4b   : > { %1149 = vmatpush3.bf16.xpose.msra.mxu0 %v534_v11 }
  0x4c   : > { %1175 = vmatprep.subr.msk.bf16.mxu0 %vm505_vm0, %v345_v12 }
  0x53   : > { %1151 = vmatpush3.bf16.xpose.msra.mxu0 %v531_v16 }
  0x5a   : > { %1153 = vmatmul.mubr.msk.bf16.vlgmr.msra.gmra.mxu0 %vm505_vm0, %v1391_v0  ;;  %v1221_v0 = vld [vmem:[%s1770_s1 + $0x20] sm:$0xff]  }
  0x5b   : > { %1154 = vmatprep.mubr.msk.bf16.mxu0 %vm505_vm0, %v1218_v17 }
  0x62   : > { %1155 = vmatmul.mubr.msk.bf16.gmra.mxu0 %vm505_vm0, %v1218_v17 }
  0x63   : > { %1156 = vmatprep.mubr.msk.bf16.mxu0 %vm505_vm0, %v1219_v18 }
  0x6a   : > { %1157 = vmatmul.mubr.msk.bf16.gmra.mxu0 %vm505_vm0, %v1219_v18 }
  0x6b   : > { %1158 = vmatprep.mubr.msk.bf16.mxu0 %vm505_vm0, %v1220_v19 }
  0x72   : > { %1159 = vmatmul.mubr.msk.bf16.gmra.mxu0 %vm505_vm0, %v1220_v19 }
  0x73   : > { %1160 = vmatprep.mubr.msk.bf16.mxu0 %vm505_vm0, %v1221_v0 }
  0x7a   : > { %1161 = vmatmul.mubr.msk.bf16.gmra.mxu0 %vm505_vm0, %v1221_v0 }
  0x7b   : > { %1162 = vmatprep.mubr.msk.bf16.mxu0 %vm505_vm0, %v1222_v20 }
  0x82   : > { %1163 = vmatmul.mubr.msk.bf16.gmra.mxu0 %vm505_vm0, %v1222_v20 }
  0x83   : > { %1164 = vmatprep.mubr.msk.bf16.mxu0 %vm505_vm0, %v1223_v21 }
  0x8a   : > { %1165 = vmatmul.mubr.msk.bf16.gmra.mxu0 %vm505_vm0, %v1223_v21 }
  0x8b   : > { %1166 = vmatprep.mubr.msk.bf16.mxu0 %vm505_vm0, %v1224_v22 }
  0x91   : > { %v1551_v23 = vpop.permute.xlu0 %457  ;;  %v1553_v24 = vpop.permute.xlu1 %447 }
  0x92   : > { %1167 = vmatmul.mubr.msk.bf16.gmra.mxu0 %vm505_vm0, %v1224_v22 }
  0x95   : > { %v1555_v25 = vpop.permute.xlu0 %462  ;;  %v1557_v26 = vpop.permute.xlu1 %452 }
  0x99   : > { %v1559_v27 = vpop.permute.xlu0 %437  ;;  %v1561_v28 = vpop.permute.xlu1 %442 }
  0x9d   : > { %v1563_v29 = vpop.permute.xlu0 %427  ;;  %v1565_v30 = vpop.permute.xlu1 %432 }
  0xa1   : > { %v1567_v31 = vpop.permute.xlu0 %417  ;;  %v1569_v32 = vpop.permute.xlu1 %422 }
  0xa5   : > { %v1571_v33 = vpop.permute.xlu0 %407  ;;  %v1573_v34 = vpop.permute.xlu1 %412 }
  0xa9   : > { %v398_v35 = vpop.permute.xlu0 %397  ;;  %v403_v36 = vpop.permute.xlu1 %402 }
  0xad   : > { %v388_v37 = vpop.permute.xlu0 %387  ;;  %v393_v41 = vpop.permute.xlu1 %392 }
 0x11a   : > { %v612_v38 = vpop.f32.mrf.mxu0 }
 0x11b   : > { %v613_v39 = vadd.f32 %v612_v38, %v388_v37 }
 0x11c   : > { %v614_v40 = vpop.f32.mrf.mxu0 }
 0x11d   : > { %v615_v42 = vadd.f32 %v614_v40, %v388_v37  ;;  %v723_v43 = vmul.f32 0.2, %v613_v39  ;;  %vm691_vm1 = vcmp.gt.f32.partialorder %v613_v39, 0.0 }
 0x11e   : > { %v616_v44 = vpop.f32.mrf.mxu0 }
 0x11f   : > { %v617_v45 = vadd.f32 %v616_v44, %v393_v41  ;;  %v724_v47 = vmul.f32 0.2, %v615_v42  ;;  %vm692_vm3 = vcmp.gt.f32.partialorder %v615_v42, 0.0  ;;  %v1575_v51 = vsel %vm691_vm1, %v613_v39, %v723_v43 }
 0x120   : > { %v618_v46 = vpop.f32.mrf.mxu0 }
 0x121   : > { %vm693_vm2 = vcmp.gt.f32.partialorder %v617_v45, 0.0  ;;  %v725_v48 = vmul.f32 0.2, %v617_v45  ;;  %v619_v49 = vadd.f32 %v618_v46, %v393_v41  ;;  %v1581_v58 = vsel %vm692_vm3, %v615_v42, %v724_v47 }
 0x122   : > { %v622_v50 = vpop.f32.mrf.mxu0 }
 0x123   : > { %vm694_vm4 = vcmp.gt.f32.partialorder %v619_v49, 0.0  ;;  %v726_v52 = vmul.f32 0.2, %v619_v49  ;;  %v623_v53 = vadd.f32 %v622_v50, %v398_v35  ;;  %v1577_v54 = vsel %vm693_vm2, %v617_v45, %v725_v48 }
 0x124   : > { %v624_v55 = vpop.f32.mrf.mxu0  ;;  %v787_v56 = vpack.c.bf16 %v1577_v54, %v1575_v51 }
 0x125   : > { %v625_v57 = vadd.f32 %v624_v55, %v398_v35  ;;  %v1583_v59 = vsel %vm694_vm4, %v619_v49, %v726_v52  ;;  %v727_v62 = vmul.f32 0.2, %v623_v53  ;;  %vm695_vm5 = vcmp.gt.f32.partialorder %v623_v53, 0.0 }
 0x126   : > { %v626_v60 = vpop.f32.mrf.mxu0  ;;  %v788_v61 = vpack.c.bf16 %v1583_v59, %v1581_v58 }
 0x127   : > { %v627_v63 = vadd.f32 %v626_v60, %v403_v36  ;;  %v728_v3 = vmul.f32 0.2, %v625_v57  ;;  %vm696_vm7 = vcmp.gt.f32.partialorder %v625_v57, 0.0  ;;  %v1589_v8 = vsel %vm695_vm5, %v623_v53, %v727_v62 }
 0x128   : > { %v628_v2 = vpop.f32.mrf.mxu0 }
 0x129   : > { %vm697_vm6 = vcmp.gt.f32.partialorder %v627_v63, 0.0  ;;  %v729_v4 = vmul.f32 0.2, %v627_v63  ;;  %v629_v5 = vadd.f32 %v628_v2, %v403_v36  ;;  %v1595_v12 = vsel %vm696_vm7, %v625_v57, %v728_v3 }
 0x12a   : > { %v1587_v6 = vpop.f32.mrf.mxu0 }
 0x12b   : > { %vm698_vm8 = vcmp.gt.f32.partialorder %v629_v5, 0.0  ;;  %v730_v7 = vmul.f32 0.2, %v629_v5  ;;  %v1591_v9 = vsel %vm697_vm6, %v627_v63, %v729_v4 }
 0x12c   : > { %v634_v10 = vpop.f32.mrf.mxu0  ;;  %v789_v11 = vpack.c.bf16 %v1591_v9, %v1589_v8  ;;  %v1226_v8 = vld [vmem:[%s1772_s3 + $0x8] sm:$0xff]  }
 0x12d   : > { %v1597_v13 = vsel %vm698_vm8, %v629_v5, %v730_v7  ;;  %v1610_v45 = vadd.f32 %v634_v10, %v1571_v33 }
 0x12e   : > { %v636_v14 = vpop.f32.mrf.mxu0  ;;  %v790_v15 = vpack.c.bf16 %v1597_v13, %v1595_v12 }
 0x12f   : > { %v1614_v48 = vadd.f32 %v636_v14, %v1573_v34 }
 0x130   : > { %v1601_v16 = vpop.f32.mrf.mxu0 }
 0x132   : > { %v1603_v17 = vpop.f32.mrf.mxu0 }
 0x134   : > { %v644_v18 = vpop.f32.mrf.mxu0 }
 0x135   : > { %v1617_v49 = vadd.f32 %v644_v18, %v1567_v31 }
 0x136   : > { %v646_v19 = vpop.f32.mrf.mxu0 }
 0x137   : > { %v1620_v50 = vadd.f32 %v646_v19, %v1569_v32 }
 0x138   : > { %v1605_v0 = vpop.f32.mrf.mxu0 }
 0x13a   : > { %v1607_v20 = vpop.f32.mrf.mxu0 }
 0x13c   : > { %v654_v21 = vpop.f32.mrf.mxu0 }
 0x13d   : > { %v1624_v53 = vadd.f32 %v654_v21, %v1563_v29 }
 0x13e   : > { %v656_v22 = vpop.f32.mrf.mxu0 }
 0x13f   : > { %v1627_v55 = vadd.f32 %v656_v22, %v1565_v30  ;;  %vm708_vm6 = vcmp.gt.f32.partialorder %v1624_v53, 0.0 }
 0x140   : > { %v658_v35 = vpop.f32.mrf.mxu0 }
 0x141   : > { %v1630_v57 = vadd.f32 %v658_v35, %v1565_v30  ;;  %vm709_vm7 = vcmp.gt.f32.partialorder %v1627_v55, 0.0 }
 0x142   : > { %v662_v36 = vpop.f32.mrf.mxu0 }
 0x143   : > { %v1634_v63 = vadd.f32 %v662_v36, %v1559_v27  ;;  %vm710_vm4 = vcmp.gt.f32.partialorder %v1630_v57, 0.0 }
 0x144   : > { %v664_v37 = vpop.f32.mrf.mxu0 }
 0x145   : > { %v665_v2 = vadd.f32 %v664_v37, %v1559_v27  ;;  %vm711_vm5 = vcmp.gt.f32.partialorder %v1634_v63, 0.0 }
 0x146   : > { %v666_v38 = vpop.f32.mrf.mxu0 }
 0x147   : > { %v667_v5 = vadd.f32 %v666_v38, %v1561_v28  ;;  %vm712_vm2 = vcmp.gt.f32.partialorder %v665_v2, 0.0 }
 0x148   : > { %v668_v39 = vpop.f32.mrf.mxu0 }
 0x149   : > { %v669_v7 = vadd.f32 %v668_v39, %v1561_v28  ;;  %vm713_vm3 = vcmp.gt.f32.partialorder %v667_v5, 0.0 }
 0x14a   : > { %v672_v40 = vpop.f32.mrf.mxu0 }
 0x14b   : > { %v673_v21 = vadd.f32 %v672_v40, %v1553_v24  ;;  %v746_v36 = vmul.f32 0.2, %v669_v7  ;;  %vm714_vm0 = vcmp.gt.f32.partialorder %v669_v7, 0.0 }
 0x14c   : > { %v674_v41 = vpop.f32.mrf.mxu0 }
 0x14d   : > { %v675_v3 = vadd.f32 %v674_v41, %v1553_v24  ;;  %v744_v24 = vmul.f32 0.2, %v665_v2  ;;  %vm715_vm1 = vcmp.gt.f32.partialorder %v673_v21, 0.0 }
 0x14e   : > { %v676_v42 = vpop.f32.mrf.mxu0 }
 0x14f   : > { %v677_v10 = vadd.f32 %v676_v42, %v1557_v26  ;;  %v748_v22 = vmul.f32 0.2, %v675_v3  ;;  %vm716_vm14 = vcmp.gt.f32.partialorder %v675_v3, 0.0 }
 0x150   : > { %v678_v43 = vpop.f32.mrf.mxu0 }
 0x151   : > { %v679_v46 = vadd.f32 %v678_v43, %v1557_v26  ;;  %v749_v28 = vmul.f32 0.2, %v677_v10  ;;  %vm717_vm15 = vcmp.gt.f32.partialorder %v677_v10, 0.0  ;;  %v780_v43 = vsel %vm716_vm14, %v675_v3, %v748_v22 }
 0x152   : > { %v682_v44 = vpop.f32.mrf.mxu0  ;;  %v743_v3 = vmul.f32 0.2, %v1634_v63  ;;  %v633_v22 = vadd.f32 %v1587_v6, %v1571_v33  ;;  %vm700_vm14 = vcmp.gt.f32.partialorder %v1610_v45, 0.0 }
 0x153   : > { %v683_v60 = vadd.f32 %v682_v44, %v1551_v23  ;;  %v750_v30 = vmul.f32 0.2, %v679_v46  ;;  %vm718_vm10 = vcmp.gt.f32.partialorder %v679_v46, 0.0  ;;  %v745_v44 = vmul.f32 0.2, %v667_v5 }
 0x154   : > { %v684_v47 = vpop.f32.mrf.mxu0  ;;  %v731_v6 = vmul.f32 0.2, %v633_v22 }
 0x155   : > { %v685_v52 = vadd.f32 %v684_v47, %v1551_v23  ;;  %v751_v27 = vmul.f32 0.2, %v683_v60  ;;  %vm719_vm13 = vcmp.gt.f32.partialorder %v683_v60, 0.0  ;;  %v782_v39 = vsel %vm718_vm10, %v679_v46, %v750_v30 }
 0x156   : > { %v686_v62 = vpop.f32.mrf.mxu0  ;;  %v800_v47 = vpack.c.bf16 %v782_v39, %v780_v43  ;;  %v778_v46 = vsel %vm714_vm0, %v669_v7, %v746_v36  ;;  %v741_v7 = vmul.f32 0.2, %v1627_v55  ;;  %vm704_vm10 = vcmp.gt.f32.partialorder %v1617_v49, 0.0 }
 0x157   : > { %v687_v4 = vadd.f32 %v686_v62, %v1555_v25  ;;  %v752_v18 = vmul.f32 0.2, %v685_v52  ;;  %vm720_vm11 = vcmp.gt.f32.partialorder %v685_v52, 0.0  ;;  %v783_v42 = vsel %vm719_vm13, %v683_v60, %v751_v27 }
 0x158   : > { %v688_v14 = vpop.f32.mrf.mxu0  ;;  %v781_v62 = vsel %vm717_vm15, %v677_v10, %v749_v28  ;;  %v653_v60 = vadd.f32 %v1607_v20, %v1563_v29  ;;  %v740_v10 = vmul.f32 0.2, %v1624_v53  ;;  %v777_v29 = vsel %vm713_vm3, %v667_v5, %v745_v44 }
 0x159   : > { %v753_v23 = vmul.f32 0.2, %v687_v4  ;;  %v689_v19 = vadd.f32 %v688_v14, %v1555_v25  ;;  %vm721_vm9 = vcmp.gt.f32.partialorder %v687_v4, 0.0  ;;  %v784_v37 = vsel %vm720_vm11, %v685_v52, %v752_v18 }
 0x15a   : > { %v747_v25 = vmul.f32 0.2, %v673_v21  ;;  %v742_v52 = vmul.f32 0.2, %v1630_v57  ;;  %v639_v20 = vadd.f32 %v1601_v16, %v1573_v34  ;;  %v775_v5 = vsel %vm711_vm5, %v1634_v63, %v743_v3 }
 0x15b   : > { %v754_v35 = vmul.f32 0.2, %v689_v19  ;;  %vm722_vm12 = vcmp.gt.f32.partialorder %v689_v19, 0.0  ;;  %v785_v26 = vsel %vm721_vm9, %v687_v4, %v753_v23  ;;  %v649_v4 = vadd.f32 %v1605_v0, %v1569_v32 }
 0x15c   : > { %v801_v40 = vpack.c.bf16 %v785_v26, %v783_v42  ;;  %v779_v30 = vsel %vm715_vm1, %v673_v21, %v747_v25  ;;  %v776_v0 = vsel %vm712_vm2, %v665_v2, %v744_v24  ;;  %v774_v23 = vsel %vm710_vm4, %v1630_v57, %v742_v52 }
 0x15d   : > { %v786_v38 = vsel %vm722_vm12, %v689_v19, %v754_v35  ;;  %v799_v32 = vpack.c.bf16 %v781_v62, %v779_v30  ;;  %v798_v14 = vpack.c.bf16 %v778_v46, %v776_v0  ;;  %v738_v18 = vmul.f32 0.2, %v649_v4 }
 0x15e   : > { %v802_v41 = vpack.c.bf16 %v786_v38, %v784_v37  ;;  %v643_v2 = vadd.f32 %v1603_v17, %v1567_v31  ;;  %vm706_vm8 = vcmp.gt.f32.partialorder %v649_v4, 0.0  ;;  %v739_v19 = vmul.f32 0.2, %v653_v60 }
 0x15f   : > { %v736_v34 = vmul.f32 0.2, %v1617_v49  ;;  %vm707_vm9 = vcmp.gt.f32.partialorder %v653_v60, 0.0  ;;  %v797_v16 = vpack.c.bf16 %v777_v29, %v775_v5  ;;  %v772_v21 = vsel %vm708_vm6, %v1624_v53, %v740_v10 }
 0x160   : > { %843 = vmatprep.subr.bf16.mxu1 %v802_v41  ;;  %v737_v57 = vmul.f32 0.2, %v1620_v50  ;;  %v796_v31 = vpack.c.bf16 %v774_v23, %v772_v21  ;;  %v773_v17 = vsel %vm709_vm7, %v1627_v55, %v741_v7  ;;  %v734_v27 = vmul.f32 0.2, %v639_v20 }
 0x161   : > { %844 = vmatpush1.bf16.msra.mxu1 %v801_v40  ;;  %vm705_vm11 = vcmp.gt.f32.partialorder %v1620_v50, 0.0  ;;  %v770_v63 = vsel %vm706_vm8, %v649_v4, %v738_v18  ;;  %vm702_vm12 = vcmp.gt.f32.partialorder %v639_v20, 0.0  ;;  %v735_v35 = vmul.f32 0.2, %v643_v2 }
 0x162   : > { %845 = vmatprep.subr.bf16.mxu1 %v800_v47  ;;  %v771_v36 = vsel %vm707_vm9, %v653_v60, %v739_v19  ;;  %v732_v53 = vmul.f32 0.2, %v1610_v45  ;;  %vm703_vm13 = vcmp.gt.f32.partialorder %v643_v2, 0.0  ;;  %v768_v55 = vsel %vm704_vm10, %v1617_v49, %v736_v34 }
 0x163   : > { %v795_v28 = vpack.c.bf16 %v773_v17, %v771_v36  ;;  %v733_v26 = vmul.f32 0.2, %v1614_v48  ;;  %v794_v37 = vpack.c.bf16 %v770_v63, %v768_v55  ;;  %v769_v38 = vsel %vm705_vm11, %v1620_v50, %v737_v57 }
 0x164   : > { %vm701_vm15 = vcmp.gt.f32.partialorder %v1614_v48, 0.0  ;;  %v766_v33 = vsel %vm702_vm12, %v639_v20, %v734_v27  ;;  %v767_v39 = vsel %vm703_vm13, %v643_v2, %v735_v35  ;;  %vm699_vm0 = vcmp.gt.f32.partialorder %v633_v22, 0.0 }
 0x165   : > { %846 = vmatpush1.bf16.msra.mxu1 %v799_v32  ;;  %v793_v25 = vpack.c.bf16 %v769_v38, %v767_v39  ;;  %v764_v41 = vsel %vm700_vm14, %v1610_v45, %v732_v53  ;;  %v765_v49 = vsel %vm701_vm15, %v1614_v48, %v733_v26  ;;  %v763_v24 = vsel %vm699_vm0, %v633_v22, %v731_v6  ;;  %v1225_v45 = vld [vmem:[%s1772_s3] sm:$0xff]  }
 0x166   : > { %847 = vmatprep.subr.bf16.mxu1 %v798_v14  ;;  %v792_v42 = vpack.c.bf16 %v766_v33, %v764_v41  ;;  %v791_v40 = vpack.c.bf16 %v765_v49, %v763_v24  ;;  %vm931_vm9 = vcmask 261120   ;;  %vm976_vm10 = vcmask 1043456  }
 0x169   : > { %848 = vmatpush1.bf16.msra.mxu1 %v797_v16 }
 0x16a   : > { %849 = vmatprep.subr.bf16.mxu1 %v796_v31  ;;  %v920_v31 = vld [vmem:[%s1774_s5] sm:$0x3] }
 0x16d   : > { %850 = vmatpush1.bf16.msra.mxu1 %v795_v28 }
 0x16e   : > { %851 = vmatprep.subr.bf16.mxu1 %v794_v37 }
 0x171   : > { %852 = vmatpush1.bf16.msra.mxu1 %v793_v25 }
 0x172   : > { %853 = vmatprep.subr.bf16.mxu1 %v792_v42 }
 0x175   : > { %854 = vmatpush1.bf16.msra.mxu1 %v791_v40 }
 0x176   : > { %855 = vmatprep.subr.bf16.mxu1 %v790_v15 }
 0x179   : > { %856 = vmatpush1.bf16.msra.mxu1 %v789_v11  ;;  %v824_v11 = vpop.permute.xlu0 %823 }
 0x17a   : > { %857 = vmatprep.subr.bf16.mxu1 %v788_v61  ;;  %v829_v61 = vpop.permute.xlu1 %828 }
 0x17d   : > { %858 = vmatpush1.bf16.msra.mxu1 %v787_v56  ;;  %v814_v48 = vpop.permute.xlu0 %813 }
 0x17e   : > { %v819_v15 = vpop.permute.xlu1 %818 }
 0x180   : > { %876 = vmatmul.mubr.bf16.vlgmr.msra.gmra.mxu1 %v1225_v45 }
 0x181   : > { %885 = vmatprep.mubr.bf16.mxu1 %v1297_v1  ;;  %v929_v17 = vpop.permute.xlu0 %928 }
 0x188   : > { %886 = vmatmul.mubr.bf16.gmra.mxu1 %v1226_v8 }
 0x189   : > { %967 = vmatprep.mubr.bf16.mxu1 %v1297_v1 }
 0x240   : > { %v877_v58 = vpop.f32.mrf.mxu1 }
 0x241   : > { %v878_v3 = vadd.f32 %v877_v58, %v814_v48 }
 0x242   : > { %v879_v59 = vpop.f32.mrf.mxu1 }
 0x243   : > { %v880_v44 = vadd.f32 %v879_v59, %v814_v48  ;;  %v904_v18 = vmul.f32 0.2, %v878_v3  ;;  %vm896_vm8 = vcmp.gt.f32.partialorder %v878_v3, 0.0 }
 0x244   : > { %v881_v9 = vpop.f32.mrf.mxu1 }
 0x245   : > { %v882_v62 = vadd.f32 %v881_v9, %v819_v15  ;;  %v905_v10 = vmul.f32 0.2, %v880_v44  ;;  %vm897_vm6 = vcmp.gt.f32.partialorder %v880_v44, 0.0  ;;  %v912_v21 = vsel %vm896_vm8, %v878_v3, %v904_v18 }
 0x246   : > { %v883_v12 = vpop.f32.mrf.mxu1 }
 0x247   : > { %v884_v51 = vadd.f32 %v883_v12, %v819_v15  ;;  %v906_v0 = vmul.f32 0.2, %v882_v62  ;;  %vm898_vm7 = vcmp.gt.f32.partialorder %v882_v62, 0.0  ;;  %v913_v5 = vsel %vm897_vm6, %v880_v44, %v905_v10 }
 0x248   : > { %v887_v13 = vpop.f32.mrf.mxu1 }
 0x249   : > { %v888_v50 = vadd.f32 %v887_v13, %v824_v11  ;;  %v907_v4 = vmul.f32 0.2, %v884_v51  ;;  %vm899_vm2 = vcmp.gt.f32.partialorder %v884_v51, 0.0  ;;  %v914_v34 = vsel %vm898_vm7, %v882_v62, %v906_v0 }
 0x24a   : > { %v889_v54 = vpop.f32.mrf.mxu1  ;;  %v921_v57 = vpack.c.bf16 %v914_v34, %v912_v21 }
 0x24b   : > { %v890_v56 = vadd.f32 %v889_v54, %v824_v11  ;;  %v908_v30 = vmul.f32 0.2, %v888_v50  ;;  %vm900_vm4 = vcmp.gt.f32.partialorder %v888_v50, 0.0  ;;  %v915_v20 = vsel %vm899_vm2, %v884_v51, %v907_v4 }
 0x24c   : > { %v891_v43 = vpop.f32.mrf.mxu1  ;;  %v922_v16 = vpack.c.bf16 %v915_v20, %v913_v5 }
 0x24d   : > { %v892_v47 = vadd.f32 %v891_v43, %v829_v61  ;;  %v909_v1 = vmul.f32 0.2, %v890_v56  ;;  %vm901_vm3 = vcmp.gt.f32.partialorder %v890_v56, 0.0  ;;  %v916_v23 = vsel %vm900_vm4, %v888_v50, %v908_v30 }
 0x24e   : > { %v893_v52 = vpop.f32.mrf.mxu1 }
 0x24f   : > { %vm902_vm1 = vcmp.gt.f32.partialorder %v892_v47, 0.0  ;;  %v910_v46 = vmul.f32 0.2, %v892_v47  ;;  %v894_v60 = vadd.f32 %v893_v52, %v829_v61  ;;  %v917_v14 = vsel %vm901_vm3, %v890_v56, %v909_v1 }
 0x251   : > { %vm903_vm5 = vcmp.gt.f32.partialorder %v894_v60, 0.0  ;;  %v911_v32 = vmul.f32 0.2, %v894_v60  ;;  %v918_v7 = vsel %vm902_vm1, %v892_v47, %v910_v46 }
 0x252   : > { %v923_v19 = vpack.c.bf16 %v918_v7, %v916_v23 }
 0x253   : > { %v919_v29 = vsel %vm903_vm5, %v894_v60, %v911_v32 }
 0x254   : > { %v924_v2 = vpack.c.bf16 %v919_v29, %v917_v14 }
 0x256   : > { %947 = vmatprep.subr.bf16.mxu1 %v924_v2 }
 0x257   : > { %948 = vmatpush1.bf16.msra.mxu1 %v923_v19 }
 0x258   : > { %949 = vmatprep.subr.bf16.mxu1 %v922_v16 }
 0x25b   : > { %950 = vmatpush1.bf16.msra.mxu1 %v921_v57 }
 0x25e   : > { %1125 = vmatmul.mubr.msk.bf16.vlgmr.msra.gmra.mxu1 %vm931_vm9, %v920_v31 }
 0x31e   : > { %v969_v27 = vpop.f32.mrf.mxu1 }
 0x31f   : > { %v970_v63 = vadd.f32 %v969_v27, %v929_v17 }
 0x320   : > { %v971_v22 = vpop.f32.mrf.mxu1 }
 0x321   : > { %v977_v35 = vsel %vm976_vm10, %v970_v63, -inf  ;;  %v972_v36 = vadd.f32 %v971_v22, %v929_v17 }
 0x322   : > { %v978_v53 = vrot.slane %v977_v35, 4  ;;  %v973_v28 = vpop.f32.mrf.mxu1 }
 0x323   : > { %v984_v55 = vsel %vm976_vm10, %v972_v36, -inf }
 0x324   : > { %v979_v26 = vmax.f32 %v977_v35, %v978_v53  ;;  %v985_v37 = vrot.slane %v984_v55, 4  ;;  %v974_v38 = vpop.f32.mrf.mxu1 }
 0x326   : > { %v980_v33 = vrot.slane %v979_v26, 2  ;;  %v986_v6 = vmax.f32 %v984_v55, %v985_v37 }
 0x328   : > { %v981_v39 = vmax.f32 %v979_v26, %v980_v33  ;;  %v987_v25 = vrot.slane %v986_v6, 2 }
 0x32a   : > { %v982_v41 = vrot.slane %v981_v39, 1  ;;  %v988_v42 = vmax.f32 %v986_v6, %v987_v25 }
 0x32c   : > { %v983_v49 = vmax.f32 %v981_v39, %v982_v41  ;;  %v989_v24 = vrot.slane %v988_v42, 1 }
 0x32e   : > { %v991_v40 = vsub.f32 %v970_v63, %v983_v49  ;;  %v990_v45 = vmax.f32 %v988_v42, %v989_v24 }
 0x330   : > { %v993_v8 = vmul.f32 1.442695, %v991_v40  ;;  %v992_v58 = vsub.f32 %v972_v36, %v990_v45 }
 0x332   : > { %1227 = vpow2.f32 %v993_v8  ;;  %v995_v59 = vmul.f32 1.442695, %v992_v58 }
 0x334   : > { %1229 = vpow2.f32 %v995_v59 }
 0x33f   : > { %v1228_v61 = vpop.eup %1227 }
 0x340   : > { %v997_v9 = vsel %vm976_vm10, %v1228_v61, 0.0 }
 0x341   : > { %v1230_v11 = vpop.eup %1229  ;;  %v998_v12 = vrot.slane %v997_v9, 4 }
 0x342   : > { %v1004_v13 = vsel %vm976_vm10, %v1230_v11, 0.0 }
 0x343   : > { %v999_v15 = vadd.f32 %v998_v12, %v997_v9  ;;  %v1005_v51 = vrot.slane %v1004_v13, 4 }
 0x345   : > { %v1000_v54 = vrot.slane %v999_v15, 2  ;;  %v1006_v56 = vadd.f32 %v1005_v51, %v1004_v13 }
 0x347   : > { %v1001_v48 = vadd.f32 %v1000_v54, %v999_v15  ;;  %v1007_v50 = vrot.slane %v1006_v56, 2 }
 0x349   : > { %v1002_v43 = vrot.slane %v1001_v48, 1  ;;  %v1008_v44 = vadd.f32 %v1007_v50, %v1006_v56 }
 0x34b   : > { %v1003_v47 = vadd.f32 %v1002_v43, %v1001_v48  ;;  %v1009_v62 = vrot.slane %v1008_v44, 1 }
 0x34d   : > { %1231 = vrcp.f32 %v1003_v47  ;;  %v1010_v4 = vadd.f32 %v1009_v62, %v1008_v44 }
 0x34f   : > { %1233 = vrcp.f32 %v1010_v4 }
 0x35a   : > { %v1232_v52 = vpop.eup %1231 }
 0x35b   : > { %v1013_v46 = vmul.f32 %v1232_v52, %v1228_v61 }
 0x35c   : > { %v1234_v1 = vpop.eup %1233 }
 0x35d   : > { %v1014_v60 = vmul.f32 %v1234_v1, %v1230_v11  ;;  %1027 = sbr.rel (!%p1377_p5) target bundleno = 892 (0x37c), region = 52 }
 0x35f   : > { %v1017_v3 = vcombine.low %v1013_v46, %v1014_v60 }
 0x361   : > { %1019 = vst [vmem:[%s284_s16] sm:$0xff] %v1017_v3 }
 0x362   : > { %s1786_s20 = smov (!%p1030_p11, %s1029_s20), 2 }
 0x363   : > { %s1727_s21 = sshll.u32 %s1786_s20, 6 }
 0x364   : > { %s1034_s22 = ssub.s32 128, %s1727_s21 }
 0x365   : > { %1035 = vsyncadd %s1722_s17, %s1034_s22  ;;  %p1129_p12 = scmp.ne.s32.totalorder %s1727_s21, 0  ;;  %s1135_s23 = sshll.u32 %s1360_s28, 7 }
 0x366   : > { %s1038_s8 = scalar_lea.hbm %s1776_s7, %s1135_s23  ;;  %s1041_s9 = sshll.u32 %s284_s16, 4  ;;  %s1042_s9 = int_to_ptr.vmem [resolvable:$true] %s1041_s9 }
 0x367   : > { %s1235_s19 = scalar_lea.vmem %s1042_s9, %s1727_s21  ;;  %s1298_s13 = smov [#allocation2]  }
 0x368   : > { %p1236_p13 = scmp.ne.s32.totalorder %s1042_s9, %s1235_s19  ;;  %s1239_s14 = sshll.u32 %s1298_s13, 4  ;;  %s1240_s14 = int_to_ptr.vmem [resolvable:$false] %s1239_s14 }
 0x369   : > { %s1241_s15 = scalar_lea.vmem %s1240_s14, 256  ;;  %p1242_p2 = scmp.lt.s32.totalorder %s1042_s9, %s1240_s14 }
 0x36a   : > { %p1237_p0 = pnand %p1236_p13, %p1129_p12  ;;  %p1243_p3 = scmp.lt.s32.totalorder %s1241_s15, %s1235_s19 }
 0x36c   : > { %p1238_p1 = pneg %p1237_p0  ;;  %p1244_p4 = por %p1243_p3, %p1242_p2 }
 0x36e   : > { %p1245_p5 = pnand %p1244_p4, %p1238_p1 }
 0x370   : > { %1248 = shalt.err (!%p1245_p5)
}
 0x371   : > { %s1249_s28 = scalar_lea.hbm %s1038_s8, %s1727_s21  ;;  %s1253_s20 = scalar_lea.hbm %s1776_s7, 192 }
 0x372   : > { %p1250_p7 = scmp.ne.s32.totalorder %s1038_s8, %s1249_s28  ;;  %p1254_p10 = scmp.lt.s32.totalorder %s1038_s8, %s1776_s7 }
 0x373   : > { %p1255_p11 = scmp.lt.s32.totalorder %s1253_s20, %s1249_s28 }
 0x374   : > { %p1251_p8 = pnand %p1250_p7, %p1129_p12 }
 0x375   : > { %p1256_p13 = por %p1255_p11, %p1254_p10 }
 0x376   : > { %p1252_p9 = pneg %p1251_p8 }
 0x378   : > { %p1257_p0 = pnand %p1256_p13, %p1252_p9 }
 0x37a   : > { %1260 = shalt.err (!%p1257_p0)
}
 0x37b   : > { %1044 = dma.vmem_to_hbm [thread:$0]  (%p1129_p12), %s1042_s9, %s1727_s21, %s1038_s8, %s1722_s17  }
 0x37c PF: > { %p1181_p1 = scmp.ge.s32.totalorder %s1295_s27, 2  ;;  %s1053_s29 = sand.u32 1, %s1283_s24  }
 0x37d   : > { %s1054_s11 = scalar_lea.sflag [#allocation3], %s1053_s29 }
 0x37e   : > { %p1178_p2 = pnand %p1181_p1, %p1381_p6 }
 0x380   : > { %p1179_p3 = pneg %p1178_p2 }
 0x382   : > { %1278 = dma.done.wait (%p1179_p3), %s1054_s11, 128  }
 0x383   : > { %1280 = vsyncadd (%p1179_p3), %s1054_s11, 4294967168  ;;  %p17_p4 = scmp.ge.s32.totalorder %s1364_s30, 4   ;;  %s1779_s24 = smov %s1287_s25 }
 0x384   : > { %s1780_s25 = smov %s1291_s26  ;;  %s1781_s26 = smov %s1375_s10 }
 0x385   : > { %s1782_s27 = smov %s1364_s30  ;;  %19 = sbr.rel (!%p17_p4) target bundleno = 3 (0x3), region = 83 }
 0x38a   :  { %1059 = vsyncpa [#allocation3], 1 }
 0x38b   :  { %1061 = vsyncpa [#allocation3 + $0x1], 1 }

</bundles_post_ra>
